<compile_context>
chip_gen: v6e
topology: v6e:2x2x1
jax: 0.10.0
libtpu: 0.0.40
codegen_flags: <defaults>
</compile_context>

<pallas_src>
import jax
import jax.numpy as jnp
from jax.experimental import pallas as pl
from jax.experimental.pallas import tpu as pltpu


def _cdiv(a, b):
    return -(-a // b)


def _mse_partial_kernel(x_ref, t_ref, o_ref, acc_ref):
    # Grid: (slice i [parallel], step j [arbitrary / reduction]).
    j = pl.program_id(1)

    @pl.when(j == 0)
    def _():
        acc_ref[...] = jnp.zeros_like(acc_ref)

    # x_ref / t_ref: (1, block_rows, 128). Cast to f32 for accumulation
    # precision (also handles bf16 inputs without a wrapper upcast).
    d = x_ref[0].astype(jnp.float32) - t_ref[0].astype(jnp.float32)
    sq = d * d
    # Fold the (block_rows, 128) tile onto a vreg-shaped (8, 128) accumulator:
    # the reshape matches the sublane tiling, so this is purely elementwise
    # vreg adds on the VPU — no XLU reduce inside the hot loop.
    acc_ref[...] += sq.reshape(-1, 8, 128).sum(axis=0)

    # Each slice writes its own lane-dense partial-sum block (safe under
    # megacore parallelism of the leading axis).
    @pl.when(j == pl.num_programs(1) - 1)
    def _():
        o_ref[0] = acc_ref[...]


def content_loss(x, target, *, block_rows=4096, num_slices=2):
    """Pallas equivalent of ContentLoss.forward.

    Returns (input_unchanged, mse_loss_scalar) — PyTorch stores the loss as an
    attribute and returns the input; here we return both explicitly.
    """
    assert x.shape == target.shape, "input and target must have the same shape"
    total = x.size
    lanes = 128

    x_flat = x.reshape(-1)
    t_flat = target.reshape(-1)

    rows = _cdiv(total, lanes)

    # Tile sizing: big enough to amortize the ~0.35 us per-step overhead,
    # small enough that 2 inputs x 2 pipeline buffers fit the default scoped
    # VMEM on every generation (4096 x 128 x 4B = 2 MiB per input tile
    # -> 8 MiB double-buffered; fits v5e's 16 MiB and v7x's 32 MiB defaults).
    br = min(block_rows, max(1, _cdiv(rows, num_slices)))
    br = _cdiv(br, 8) * 8                      # sublane-aligned (>= 8)
    steps = max(1, _cdiv(rows, num_slices * br))
    padded_rows = num_slices * steps * br
    padded_total = padded_rows * lanes

    # Pad both operands identically with zeros: padded diff is 0 and
    # contributes nothing to the sum; we divide by the true element count.
    pad = padded_total - total
    if pad:
        x_flat = jnp.pad(x_flat, (0, pad))
        t_flat = jnp.pad(t_flat, (0, pad))

    x3 = x_flat.reshape(num_slices, steps * br, lanes)
    t3 = t_flat.reshape(num_slices, steps * br, lanes)

    elt_bytes = jnp.dtype(x.dtype).itemsize
    cost = pl.CostEstimate(
        flops=3 * padded_total,
        transcendentals=0,
        bytes_accessed=2 * padded_total * elt_bytes + num_slices * 8 * lanes * 4,
    )

    partials = pl.pallas_call(
        _mse_partial_kernel,
        out_shape=jax.ShapeDtypeStruct((num_slices, 8, lanes), jnp.float32),
        grid_spec=pltpu.PrefetchScalarGridSpec(
            num_scalar_prefetch=0,
            grid=(num_slices, steps),
            in_specs=[
                pl.BlockSpec((1, br, lanes), lambda i, j: (i, j, 0)),
                pl.BlockSpec((1, br, lanes), lambda i, j: (i, j, 0)),
            ],
            out_specs=pl.BlockSpec((1, 8, lanes), lambda i, j: (i, 0, 0)),
            scratch_shapes=[pltpu.VMEM((8, lanes), jnp.float32)],
        ),
        compiler_params=pltpu.CompilerParams(
            dimension_semantics=("parallel", "arbitrary"),
        ),
        cost_estimate=cost,
    )(x3, t3)

    # Final cross-lane/sublane reduce of the per-slice partials in the wrapper.
    loss = jnp.sum(partials) / jnp.float32(total)

    # Identity pass-through (ContentLoss.forward returns its input unchanged).
    return x, loss


if __name__ == "__main__":
    # Small shapes consistent with conv activations fed to ContentLoss (NCHW).
    N, C, H, W = 2, 4, 16, 16
    key = jax.random.PRNGKey(0)
    k_x, k_t = jax.random.split(key)

    x = jax.random.normal(k_x, (N, C, H, W), dtype=jnp.float32)
    # "target" is a detached feature map in the PyTorch module; constructed
    # deterministically in-script here.
    target = jax.random.normal(k_t, (N, C, H, W), dtype=jnp.float32)

    out, loss = content_loss(x, target)
    out = jax.block_until_ready(out)
    loss = jax.block_until_ready(loss)

    # Reference check (plain JAX).
    ref_loss = jnp.mean((x - target) ** 2)
    assert jnp.allclose(loss, ref_loss, rtol=1e-5, atol=1e-6), (loss, ref_loss)
    assert jnp.array_equal(out, x)  # forward returns input unchanged

    print("KERNEL_OK")
</pallas_src>

<mosaic_0001>
module attributes {stable_mosaic.version = 11 : i64} {
  func.func @_mse_partial_kernel(%arg0: i32, %arg1: i32, %arg2: memref<1x8x128xf32, #tpu.memory_space<vmem>>, %arg3: memref<1x8x128xf32, #tpu.memory_space<vmem>>, %arg4: memref<1x8x128xf32, #tpu.memory_space<vmem>>, %arg5: memref<8x128xf32, #tpu.memory_space<vmem>>) attributes {dimension_semantics = [#tpu.dimension_semantics<parallel>, #tpu.dimension_semantics<arbitrary>], iteration_bounds = array<i64: 2, 1>, scalar_prefetch = 0 : i64, scratch_operands = 1 : i64, tpu.core_type = #tpu.core_type<tc>, window_params = [{transform_indices = @transform_0, window_bounds = array<i64: 1, 8, 128>}, {transform_indices = @transform_1, window_bounds = array<i64: 1, 8, 128>}, {transform_indices = @transform_2, window_bounds = array<i64: 1, 8, 128>}]} {
    %c0_i32 = arith.constant 0 : i32
    %0 = arith.cmpi eq, %arg1, %c0_i32 : i32
    %1 = arith.extui %0 : i1 to i32
    %c0_i32_0 = arith.constant 0 : i32
    %2 = arith.cmpi ne, %1, %c0_i32_0 : i32
    scf.if %2 {
      %cst_12 = arith.constant 0.000000e+00 : f32
      %17 = vector.broadcast %cst_12 : f32 to vector<8x128xf32>
      %c0_13 = arith.constant 0 : index
      %c0_14 = arith.constant 0 : index
      %18 = vector.load %arg5[%c0_13, %c0_14] : memref<8x128xf32, #tpu.memory_space<vmem>>, vector<8x128xf32>
      tpu.vector_store %arg5[%c0_13, %c0_14], %17 {strides = array<i32>} : memref<8x128xf32, #tpu.memory_space<vmem>>, vector<8x128xf32>,
    } else {
    }
    %c0 = arith.constant 0 : index
    %c0_1 = arith.constant 0 : index
    %c0_2 = arith.constant 0 : index
    %3 = vector.load %arg2[%c0, %c0_1, %c0_2] : memref<1x8x128xf32, #tpu.memory_space<vmem>>, vector<1x8x128xf32>
    %4 = vector.shape_cast %3 : vector<1x8x128xf32> to vector<8x128xf32>
    %c0_3 = arith.constant 0 : index
    %c0_4 = arith.constant 0 : index
    %c0_5 = arith.constant 0 : index
    %5 = vector.load %arg3[%c0_3, %c0_4, %c0_5] : memref<1x8x128xf32, #tpu.memory_space<vmem>>, vector<1x8x128xf32>
    %6 = vector.shape_cast %5 : vector<1x8x128xf32> to vector<8x128xf32>
    %7 = arith.subf %4, %6 : vector<8x128xf32>
    %8 = arith.mulf %7, %7 : vector<8x128xf32>
    %c0_6 = arith.constant 0 : index
    %c0_7 = arith.constant 0 : index
    %9 = vector.load %arg5[%c0_6, %c0_7] : memref<8x128xf32, #tpu.memory_space<vmem>>, vector<8x128xf32>
    %10 = vector.shape_cast %8 : vector<8x128xf32> to vector<1x8x128xf32>
    %cst = arith.constant dense<0.000000e+00> : vector<8x128xf32>
    %11 = vector.multi_reduction <add>, %10, %cst [0] : vector<1x8x128xf32> to vector<8x128xf32>
    %12 = arith.addf %9, %11 : vector<8x128xf32>
    %c0_8 = arith.constant 0 : index
    %c0_9 = arith.constant 0 : index
    %13 = vector.load %arg5[%c0_8, %c0_9] : memref<8x128xf32, #tpu.memory_space<vmem>>, vector<8x128xf32>
    tpu.vector_store %arg5[%c0_8, %c0_9], %12 {strides = array<i32>} : memref<8x128xf32, #tpu.memory_space<vmem>>, vector<8x128xf32>,
    %c0_i32_10 = arith.constant 0 : i32
    %14 = arith.cmpi eq, %arg1, %c0_i32_10 : i32
    %15 = arith.extui %14 : i1 to i32
    %c0_i32_11 = arith.constant 0 : i32
    %16 = arith.cmpi ne, %15, %c0_i32_11 : i32
    scf.if %16 {
      %c0_12 = arith.constant 0 : index
      %c0_13 = arith.constant 0 : index
      %17 = vector.load %arg5[%c0_12, %c0_13] : memref<8x128xf32, #tpu.memory_space<vmem>>, vector<8x128xf32>
      %c0_14 = arith.constant 0 : index
      %c0_15 = arith.constant 0 : index
      %c0_16 = arith.constant 0 : index
      %18 = vector.load %arg4[%c0_14, %c0_15, %c0_16] : memref<1x8x128xf32, #tpu.memory_space<vmem>>, vector<1x8x128xf32>
      %19 = vector.shape_cast %18 : vector<1x8x128xf32> to vector<8x128xf32>
      %20 = vector.shape_cast %17 : vector<8x128xf32> to vector<1x8x128xf32>
      tpu.vector_store %arg4[%c0_14, %c0_15, %c0_16], %20 {strides = array<i32>} : memref<1x8x128xf32, #tpu.memory_space<vmem>>, vector<1x8x128xf32>,
    } else {
    }
    return
  }
  func.func @transform_0(%arg0: i32, %arg1: i32) -> (i32, i32, i32) {
    %c0_i32 = arith.constant 0 : i32
    %c0_i32_0 = arith.constant 0 : i32
    return %arg0, %arg1, %c0_i32 : i32, i32, i32
  }
  func.func @transform_1(%arg0: i32, %arg1: i32) -> (i32, i32, i32) {
    %c0_i32 = arith.constant 0 : i32
    %c0_i32_0 = arith.constant 0 : i32
    return %arg0, %arg1, %c0_i32 : i32, i32, i32
  }
  func.func @transform_2(%arg0: i32, %arg1: i32) -> (i32, i32, i32) {
    %c0_i32 = arith.constant 0 : i32
    %c0_i32_0 = arith.constant 0 : i32
    %c0_i32_1 = arith.constant 0 : i32
    return %arg0, %c0_i32, %c0_i32_0 : i32, i32, i32
  }
}

</mosaic_0001>

<bundles_post_ra>
// kernel: tpu_custom_call.1
= control target key start
LH: loop header
LB: loop body
LE: loop exit
PB: predicated region body
PF: predicated region fallthrough
CT: control target
= control target key end

     0   :  { %7 = vsyncpa [#allocation4], 0  ;;  %s753_s0 = inlined_call_operand.hbm [shape: f32[2,8,128], index: 0, kind: input, shape index: {}]   ;;  %s754_s1 = inlined_call_operand.hbm [shape: f32[2,8,128], index: 1, kind: input, shape index: {}]   ;;  %s755_s2 = inlined_call_operand.hbm [shape: f32[2,8,128], index: 2, kind: output, shape index: {}]  }
   0x1   :  { %9 = vsyncpa [#allocation4 + $0x1], 0 }
   0x2   :  { %10 = vsyncpa [#allocation7], 0 }
   0x3   :  { %12 = vsyncpa [#allocation7 + $0x1], 0 }
   0x4   :  { %13 = vsyncpa [#allocation5], 0 }
   0x5   :  { %15 = vsyncpa [#allocation5 + $0x1], 0  ;;  %s592_s9 = smov 0   ;;  %s594_s10 = smov 0  }
   0x6   :  { %s596_s11 = smov 0   ;;  %s598_s12 = smov 0  }
   0x7   :  { %s600_s13 = smov 0   ;;  %s602_s14 = smov 0  }
   0x8 LB: > { %s349_s15 = sadd.s32 4294967295, %s572_s14   ;;  %s350_s16 = sadd.s32 4294967294, %s572_s14   ;;  %s572_s14 = sphi %s602_s14, %s21_s14   ;;  %s568_s13 = sphi %s600_s13, %s767_s13   ;;  %s564_s12 = sphi %s598_s12, %s766_s12   ;;  %s560_s11 = sphi %s596_s11, %s765_s11   ;;  %s556_s10 = sphi %s594_s10, %s764_s10   ;;  %s552_s9 = sphi %s592_s9, %s763_s9  }
   0x9   : > { %s33_s17 = sadd.s32 1, %s568_s13  ;;  %s42_s18 = sadd.s32 1, %s560_s11 }
   0xa   : > { %p35_p0 = scmp.ge.s32.totalorder %s33_s17, 2  ;;  %p49_p1 = scmp.ne.s32.totalorder %s560_s11, %s556_s10 }
   0xb   : > { %p50_p2 = scmp.eq.s32.totalorder %s572_s14, 0  ;;  %p55_p3 = scmp.ne.s32.totalorder %s556_s10, %s552_s9 }
   0xc   : > { %s769_s17 = smov (%p35_p0, %s33_s17), 0  ;;  %p56_p5 = scmp.eq.s32.totalorder %s349_s15, 0 }
   0xd   : > { %p633_p4 = por %p50_p2, %p49_p1  ;;  %s37_s20 = ssub.s32 %s568_s13, %s769_s17 }
   0xe   : > { %p107_p6 = scmp.eq.s32.totalorder %s349_s15, 1  ;;  %p40_p7 = scmp.eq.s32.totalorder %s37_s20, 0 }
   0xf   : > { %p639_p8 = por %p56_p5, %p55_p3  ;;  %p113_p10 = scmp.eq.s32.totalorder %s350_s16, 1 }
  0x10   : > { %p643_p9 = por %p107_p6, %p49_p1  ;;  %p382_p13 = scmp.lt.s32.totalorder %s572_s14, 2 }
  0x11   : > { %s648_s23 = scalar_select %p40_p7, %s560_s11, %s42_s18  }
  0x12   : > { %p650_p11 = por %p113_p10, %p55_p3  ;;  %s657_s25 = sand.u32 1, %s560_s11  }
  0x13   : > { %s353_s26 = sshll.u32 %s657_s25, 3  ;;  %s354_s27 = sshll.u32 %s568_s13, 7 }
  0x14   : > { %s143_s30 = scalar_lea.hbm %s753_s0, %s354_s27  ;;  %s137_s3 = scalar_lea.vmem [#allocation3], %s353_s26 }
  0x15   : > { %s145_s4 = sshll.u32 %s137_s3, 4  ;;  %p666_p0 = pnand %p382_p13, %p633_p4  ;;  %s146_s4 = int_to_ptr.vmem [resolvable:$true] %s145_s4 }
  0x16   : > { %p357_p1 = scmp.ge.s32.totalorder %s572_s14, 1  ;;  %p169_p2 = scmp.lt.s32.totalorder %s572_s14, 3 }
  0x17   : > { %s134_s6 = scalar_lea.sflag [#allocation4], %s657_s25  ;;  %p434_p3 = pneg %p666_p0 }
  0x18   : > { %s445_s7 = scalar_lea.vmem %s146_s4, 128  ;;  %s574_s8 = smov [#allocation3]  }
  0x19   : > { %p446_p5 = scmp.ne.s32.totalorder %s146_s4, %s445_s7  ;;  %s450_s15 = sshll.u32 %s574_s8, 4  ;;  %s451_s15 = int_to_ptr.vmem [resolvable:$false] %s450_s15 }
  0x1a   : > { %s452_s16 = scalar_lea.vmem %s451_s15, 256  ;;  %p453_p4 = scmp.lt.s32.totalorder %s146_s4, %s451_s15 }
  0x1b   : > { %p448_p6 = pnand %p446_p5, %p434_p3  ;;  %p454_p10 = scmp.lt.s32.totalorder %s452_s16, %s445_s7 }
  0x1d   : > { %p449_p7 = pneg %p448_p6  ;;  %p455_p13 = por %p454_p10, %p453_p4 }
  0x1f   : > { %p456_p12 = pnand %p455_p13, %p449_p7 }
  0x21   : > { %459 = shalt.err (!%p456_p12)
}
  0x22   : > { %374 = dma.hbm_to_vmem [thread:$0]  (!%p666_p0), %s143_s30, 128, %s146_s4, %s134_s6  }
  0x23   : > { %p684_p5 = pnand %p357_p1, %p169_p2  ;;  %s162_s28 = scalar_lea.hbm %s754_s1, %s354_s27 }
  0x24   : > { %s156_s29 = scalar_lea.vmem [#allocation6], %s353_s26  ;;  %s153_s7 = scalar_lea.sflag [#allocation7], %s657_s25 }
  0x25   : > { %s164_s3 = sshll.u32 %s156_s29, 4  ;;  %s575_s30 = smov [#allocation6]   ;;  %s165_s3 = int_to_ptr.vmem [resolvable:$true] %s164_s3 }
  0x26   : > { %s473_s8 = scalar_lea.vmem %s165_s3, 128  ;;  %s478_s4 = sshll.u32 %s575_s30, 4  ;;  %s479_s4 = int_to_ptr.vmem [resolvable:$false] %s478_s4 }
  0x27   : > { %p474_p12 = scmp.ne.s32.totalorder %s165_s3, %s473_s8  ;;  %s480_s6 = scalar_lea.vmem %s479_s4, 256 }
  0x28   : > { %p481_p1 = scmp.lt.s32.totalorder %s165_s3, %s479_s4  ;;  %p482_p2 = scmp.lt.s32.totalorder %s480_s6, %s473_s8 }
  0x29   : > { %p476_p6 = pnand %p474_p12, %p434_p3 }
  0x2a   : > { %p483_p4 = por %p482_p2, %p481_p1 }
  0x2b   : > { %p477_p7 = pneg %p476_p6 }
  0x2d   : > { %p484_p10 = pnand %p483_p4, %p477_p7 }
  0x2f   : > { %487 = shalt.err (!%p484_p10)
}
  0x30   : > { %377 = dma.hbm_to_vmem [thread:$0]  (!%p666_p0), %s162_s28, 128, %s165_s3, %s153_s7  }
  0x31   : > { %173 = sbr.rel (%p684_p5) target bundleno = 81 (0x51), region = 28  ;;  %s700_s25 = sand.u32 (!%p684_p5), 1, %s556_s10  }
  0x32   : > { %s358_s26 = sshll.u32 (!%p684_p5), %s700_s25, 3  ;;  %s176_s27 = scalar_lea.sflag (!%p684_p5), [#allocation4], %s700_s25 }
  0x33   : > { %s179_s15 = scalar_lea.vmem (!%p684_p5), [#allocation3], %s358_s26 }
  0x36   : > { %539 = dma.done.wait (%p639_p8), %s176_s27, 128  }
  0x37   : > { %541 = vsyncadd (%p639_p8), %s176_s27, 4294967168  ;;  %s185_s5 = scalar_lea.sflag [#allocation7], %s700_s25  ;;  %s188_s16 = scalar_lea.vmem [#allocation6], %s358_s26 }
  0x38   : > { %543 = dma.done.wait (%p639_p8), %s185_s5, 128  }
  0x39   : > { %545 = vsyncadd (%p639_p8), %s185_s5, 4294967168  ;;  %v219_v0 = vld [vmem:[%s179_s15] sm:$0xff]  ;;  %v220_v1 = vld [vmem:[%s188_s16] sm:$0xff]  ;;  %s213_s18 = scalar_lea.vmem [#allocation8], %s358_s26  ;;  %s362_s20 = sshll.u32 %s564_s12, 7 }
  0x3a   : > { %s246_s19 = sshll.u32 %s213_s18, 4  ;;  %v221_v2 = vsub.f32 %v219_v0, %v220_v1  ;;  %s244_s3 = scalar_lea.hbm %s755_s2, %s362_s20  ;;  %s247_s19 = int_to_ptr.vmem [resolvable:$true] %s246_s19 }
  0x3b   : > { %s233_s7 = scalar_lea.sflag [#allocation5], %s700_s25  ;;  %s488_s8 = scalar_lea.vmem %s247_s19, 128 }
  0x3c   : > { %v222_v3 = vmul.f32 %v221_v2, %v221_v2  ;;  %p489_p0 = scmp.ne.s32.totalorder %s247_s19, %s488_s8  ;;  %s576_s21 = smov [#allocation8]  }
  0x3d   : > { %s492_s30 = sshll.u32 %s576_s21, 4  ;;  %s493_s30 = int_to_ptr.vmem [resolvable:$false] %s492_s30 }
  0x3e   : > { %231 = vst [vmem:[%s213_s18] sm:$0xff] %v222_v3  ;;  %p490_p8 = pnand %p489_p0, %p643_p9  ;;  %s494_s4 = scalar_lea.vmem %s493_s30, 256 }
  0x3f   : > { %p495_p13 = scmp.lt.s32.totalorder %s247_s19, %s493_s30  ;;  %p496_p5 = scmp.lt.s32.totalorder %s494_s4, %s488_s8 }
  0x40   : > { %p491_p3 = pneg %p490_p8 }
  0x41   : > { %p497_p12 = por %p496_p5, %p495_p13 }
  0x43   : > { %p498_p6 = pnand %p497_p12, %p491_p3 }
  0x45   : > { %501 = shalt.err (!%p498_p6)
}
  0x46   : > { %s502_s12 = scalar_lea.hbm %s244_s3, 128  ;;  %s506_s26 = scalar_lea.hbm %s755_s2, 256 }
  0x47   : > { %p503_p7 = scmp.ne.s32.totalorder %s244_s3, %s502_s12  ;;  %p507_p4 = scmp.lt.s32.totalorder %s244_s3, %s755_s2 }
  0x48   : > { %p508_p10 = scmp.lt.s32.totalorder %s506_s26, %s502_s12 }
  0x49   : > { %p504_p1 = pnand %p503_p7, %p643_p9 }
  0x4a   : > { %p509_p0 = por %p508_p10, %p507_p4 }
  0x4b   : > { %p505_p2 = pneg %p504_p1 }
  0x4d   : > { %p510_p8 = pnand %p509_p0, %p505_p2 }
  0x4f   : > { %513 = shalt.err (!%p510_p8)
}
  0x50   : > { %369 = dma.vmem_to_hbm [thread:$0]  (%p643_p9), %s247_s19, 128, %s244_s3, %s233_s7  }
  0x51 PF: > { %s258_s5 = sand.u32 1, %s552_s9   ;;  %p762_p3 = scmp.ge.s32.totalorder %s572_s14, 2 }
  0x52   : > { %s259_s16 = scalar_lea.sflag [#allocation5], %s258_s5 }
  0x53   : > { %p379_p13 = pnand %p762_p3, %p650_p11 }
  0x55   : > { %p380_p5 = pneg %p379_p13 }
  0x57   : > { %547 = dma.done.wait (%p380_p5), %s259_s16, 128  }
  0x58   : > { %549 = vsyncadd (%p380_p5), %s259_s16, 4294967168  ;;  %s21_s14 = sadd.s32 1, %s572_s14   ;;  %s763_s9 = smov %s556_s10 }
  0x59   : > { %p18_p12 = scmp.ge.s32.totalorder %s21_s14, 4   ;;  %s764_s10 = smov %s560_s11 }
  0x5a   : > { %s765_s11 = smov %s648_s23  ;;  %s766_s12 = smov %s568_s13 }
  0x5b   : > { %s767_s13 = smov %s769_s17  ;;  %20 = sbr.rel (!%p18_p12) target bundleno = 8 (0x8), region = 94 }
  0x60   :  { %264 = vsyncpa [#allocation4], 1 }
  0x61   :  { %266 = vsyncpa [#allocation4 + $0x1], 1 }
  0x62   :  { %267 = vsyncpa [#allocation7], 1 }
  0x63   :  { %269 = vsyncpa [#allocation7 + $0x1], 1 }
  0x64   :  { %270 = vsyncpa [#allocation5], 1 }
  0x65   :  { %272 = vsyncpa [#allocation5 + $0x1], 1 }

</bundles_post_ra>
